<compile_context>
chip_gen: v7x
topology: tpu7x:2x2x1
jax: 0.10.0
libtpu: 0.0.40
codegen_flags: <defaults>
</compile_context>

<pallas_src>
import functools
import math

import jax
import jax.numpy as jnp
import numpy as np
from jax.experimental import pallas as pl
from jax.experimental.pallas import tpu as pltpu


def _round_up(x, m):
    return ((x + m - 1) // m) * m


# ----------------------------------------------------------------------------
# Kernel 1: calc_kg_loss (TransR scores + loss), gridded over the KG batch
# ----------------------------------------------------------------------------
def _kg_loss_kernel(stk_ref, r_ref, w_ref, loss_ref, kg_acc, l2_acc,
                    *, kg_lambda, batch, tb):
    i = pl.program_id(0)

    @pl.when(i == 0)
    def _init():
        kg_acc[...] = jnp.zeros_like(kg_acc)
        l2_acc[...] = jnp.zeros_like(l2_acc)

    stk = stk_ref[...]            # (TB, 3, D)   rows: h, pos_t, neg_t
    W = w_ref[...]                # (TB, D, D)
    r = r_ref[...]                # (TB, D)

    # One batched MXU contraction instead of 3x bmm / broadcast-multiply-reduce.
    rm = jnp.einsum("bkd,bde->bke", stk, W,
                    preferred_element_type=jnp.float32)      # (TB, 3, D)

    rmh = rm[:, 0, :]             # (TB, D)
    rmp = rm[:, 1, :]
    rmn = rm[:, 2, :]

    dp = rmh + r - rmp
    dn = rmh + r - rmn
    pos_score = jnp.sum(dp * dp, axis=-1, keepdims=True)     # (TB, 1)
    neg_score = jnp.sum(dn * dn, axis=-1, keepdims=True)

    # -logsigmoid(neg - pos) == softplus(-(neg - pos)), numerically stable.
    x = neg_score - pos_score
    kg_terms = jnp.maximum(-x, 0.0) + jnp.log1p(jnp.exp(-jnp.abs(x)))

    # In-kernel row mask: only the last tile may contain padded rows.
    row = jax.lax.broadcasted_iota(jnp.int32, (tb, 1), 0)
    mask = ((row + i * tb) < batch).astype(jnp.float32)

    kg_acc[...] = kg_acc[...] + jnp.sum(kg_terms * mask)
    # Padded rows have all-zero embeddings / W_r / r, so they add nothing here.
    l2_acc[...] = l2_acc[...] + 0.5 * (jnp.sum(rm * rm) + jnp.sum(r * r))

    @pl.when(i == pl.num_programs(0) - 1)
    def _finish():
        inv_b = 1.0 / float(batch)
        loss_ref[...] = (kg_acc[...] + kg_lambda * l2_acc[...]) * inv_b


def calc_kg_loss(params, h, r, pos_t, neg_t, *, tb=128):
    """h, r, pos_t, neg_t: int32 index vectors of shape (B,)."""
    ent = params["entities"]       # (N_ent, D)
    rel = params["relations"]      # (N_rel, D)
    W_R = params["W_R"]            # (R, D, D)
    b = int(h.shape[0])
    d = int(ent.shape[1])

    # Gathers stay in XLA (glue).
    # TODO(synk): move the W_R gather in-kernel (scalar-prefetch r + manual DMA
    # from an HBM-resident table) to halve HBM traffic on the dominant B*D*D
    # stream.
    h_e = jnp.take(ent, h, axis=0)
    r_e = jnp.take(rel, r, axis=0)
    pos_e = jnp.take(ent, pos_t, axis=0)
    neg_e = jnp.take(ent, neg_t, axis=0)
    W_r = jnp.take(W_R, r, axis=0)

    stacked = jnp.stack([h_e, pos_e, neg_e], axis=1)          # (B, 3, D)

    # Keep double-buffered W_r tiles (the dominant stream) under ~24 MiB.
    tb_cap = max(8, (((24 << 20) // max(1, 2 * 4 * d * d)) // 8) * 8)
    tb = min(tb, tb_cap, _round_up(b, 8))
    b_pad = _round_up(b, tb)
    pad = b_pad - b
    if pad:
        stacked = jnp.pad(stacked, ((0, pad), (0, 0), (0, 0)))
        r_e = jnp.pad(r_e, ((0, pad), (0, 0)))
        W_r = jnp.pad(W_r, ((0, pad), (0, 0), (0, 0)))

    n_tiles = b_pad // tb
    in_bytes = 4 * (tb * 3 * d + tb * d + tb * d * d)
    vmem_limit = min(2 * in_bytes + (4 << 20), 64 * 1024 * 1024)

    loss = pl.pallas_call(
        functools.partial(_kg_loss_kernel,
                          kg_lambda=float(params["kg_lambda"]),
                          batch=b, tb=tb),
        out_shape=jax.ShapeDtypeStruct((1, 1), jnp.float32),
        grid_spec=pltpu.PrefetchScalarGridSpec(
            num_scalar_prefetch=0,
            grid=(n_tiles,),
            in_specs=[
                pl.BlockSpec((tb, 3, d), lambda i: (i, 0, 0)),
                pl.BlockSpec((tb, d), lambda i: (i, 0)),
                pl.BlockSpec((tb, d, d), lambda i: (i, 0, 0)),
            ],
            out_specs=pl.BlockSpec((1, 1), lambda i: (0, 0)),
            scratch_shapes=[pltpu.VMEM((1, 1), jnp.float32),
                            pltpu.VMEM((1, 1), jnp.float32)],
        ),
        compiler_params=pltpu.CompilerParams(
            dimension_semantics=("arbitrary",),
            vmem_limit_bytes=int(vmem_limit)),
    )(stacked, r_e, W_r)
    return loss[0, 0]


# ----------------------------------------------------------------------------
# Kernel 2: Aggregator('bi-interaction') layer + L2 row-normalisation (tiled)
# ----------------------------------------------------------------------------
def _aggregator_kernel(a_ref, egok_ref, egor_ref, w1t_ref, b1_ref, w2t_ref,
                       b2_ref, emb_ref, norm_ref, acc_ref):
    k = pl.program_id(1)

    @pl.when(k == 0)
    def _init():
        acc_ref[...] = jnp.zeros_like(acc_ref)

    # side-embedding partial sum:  A[i, k] @ ego[k]   (MXU, f32 accumulate)
    acc_ref[...] += jnp.dot(a_ref[...], egok_ref[...],
                            preferred_element_type=jnp.float32)

    @pl.when(k == pl.num_programs(1) - 1)
    def _finalize():
        ego = egor_ref[...].astype(jnp.float32)
        side = acc_ref[...]
        s = jnp.dot(ego + side, w1t_ref[...],
                    preferred_element_type=jnp.float32) + b1_ref[...]
        s = jnp.where(s >= 0.0, s, 0.01 * s)              # LeakyReLU(0.01)
        bi = jnp.dot(ego * side, w2t_ref[...],
                     preferred_element_type=jnp.float32) + b2_ref[...]
        bi = jnp.where(bi >= 0.0, bi, 0.01 * bi)
        emb = bi + s                     # message_dropout(0.1): identity in eval
        emb_ref[...] = emb
        # F.normalize(p=2, dim=1): emb / max(||emb||, 1e-12)   (rsqrt -> EUP)
        ssq = jnp.sum(emb * emb, axis=-1, keepdims=True)
        norm_ref[...] = emb * jax.lax.rsqrt(jnp.maximum(ssq, 1e-24))


def _aggregator_layer(ego, A, W1t, b1, W2t, b2, *, tm, tk,
                      use_bf16_matmul=False):
    n, d = ego.shape
    assert n % tm == 0 and n % tk == 0 and d % 128 == 0 and tk % tm == 0
    grid = (n // tm, n // tk)

    ego_k = ego.astype(jnp.bfloat16) if use_bf16_matmul else ego

    in_bytes = 4 * (tm * tk + tk * d + tm * d + 2 * d * d + 2 * d)
    out_bytes = 4 * 2 * tm * d
    vmem_limit = min(2 * (in_bytes + out_bytes) + 4 * tm * d + (4 << 20),
                     64 * 1024 * 1024)

    emb, norm = pl.pallas_call(
        _aggregator_kernel,
        out_shape=(jax.ShapeDtypeStruct((n, d), jnp.float32),
                   jax.ShapeDtypeStruct((n, d), jnp.float32)),
        grid_spec=pltpu.PrefetchScalarGridSpec(
            num_scalar_prefetch=0,
            grid=grid,
            in_specs=[
                pl.BlockSpec((tm, tk), lambda i, k: (i, k)),   # A tile
                pl.BlockSpec((tk, d), lambda i, k: (k, 0)),    # ego (reduction)
                pl.BlockSpec((tm, d), lambda i, k: (i, 0)),    # ego (row tile)
                pl.BlockSpec((d, d), lambda i, k: (0, 0)),     # W1^T (resident)
                pl.BlockSpec((1, d), lambda i, k: (0, 0)),     # b1
                pl.BlockSpec((d, d), lambda i, k: (0, 0)),     # W2^T (resident)
                pl.BlockSpec((1, d), lambda i, k: (0, 0)),     # b2
            ],
            out_specs=(pl.BlockSpec((tm, d), lambda i, k: (i, 0)),
                       pl.BlockSpec((tm, d), lambda i, k: (i, 0))),
            scratch_shapes=[pltpu.VMEM((tm, d), jnp.float32)],
        ),
        compiler_params=pltpu.CompilerParams(
            dimension_semantics=("parallel", "arbitrary"),
            vmem_limit_bytes=int(vmem_limit)),
    )(A, ego_k, ego, W1t, b1, W2t, b2)
    return emb, norm


def calc_cf_embeddings(params, *, tm=256, tk=512, use_bf16_matmul=False):
    """all_embed = ego + sum_l normalize(layer_l(...)), computed with tiled
    Pallas aggregator kernels.  Rows padded to a multiple of tk, feature dim
    padded to a multiple of 128 (lane-dense stores)."""
    ego = params["entities"]            # (N, D)
    A = params["A_in"]                  # (N, N)
    n, d = ego.shape
    d_pad = _round_up(d, 128)

    # Shrink tiles for small graphs so row padding stays modest; keep tm | tk
    # and both multiples of 128 (sublane/lane friendly, MXU friendly).
    tk = min(tk, _round_up(n, 128))
    tm = math.gcd(min(tm, tk), tk)
    n_pad = _round_up(n, tk)

    ego_p = jnp.pad(ego, ((0, n_pad - n), (0, d_pad - d)))
    A_p = jnp.pad(A, ((0, n_pad - n), (0, n_pad - n)))
    if use_bf16_matmul:
        A_p = A_p.astype(jnp.bfloat16)

    total = ego_p
    for (W1, b1, W2, b2) in params["agg_layers"]:
        W1t = jnp.pad(W1.T, ((0, d_pad - d), (0, d_pad - d)))
        b1p = jnp.pad(b1, (0, d_pad - d)).reshape(1, d_pad)
        W2t = jnp.pad(W2.T, ((0, d_pad - d), (0, d_pad - d)))
        b2p = jnp.pad(b2, (0, d_pad - d)).reshape(1, d_pad)
        ego_p, norm_p = _aggregator_layer(ego_p, A_p, W1t, b1p, W2t, b2p,
                                          tm=tm, tk=tk,
                                          use_bf16_matmul=use_bf16_matmul)
        total = total + norm_p
    return total[:n, :d]


# ----------------------------------------------------------------------------
# IKGN forward dispatch (mirrors nn.Module.forward(mode, *input))
# ----------------------------------------------------------------------------
def ikgn_forward(params, mode, *inputs):
    if mode == "calc_kg_loss":
        return calc_kg_loss(params, *inputs)
    if mode == "predict":
        # TODO(synk): sessions_score has per-sample Python loops over
        # data_neural/kg session dicts, variable-length GRU unrolls, dilated-RNN
        # index chains and an in-forward random seq_W init — no clean static
        # Pallas mapping.  Its KG-aggregation hot path (calc_cf_embeddings) is
        # implemented above as Pallas kernels.
        raise NotImplementedError("predict / sessions_score is not translatable")
    raise ValueError(mode)


# ----------------------------------------------------------------------------
# Deterministic parameter construction (synthetic; shapes follow __init__)
# ----------------------------------------------------------------------------
def make_params(key, *, n_users, n_locs, n_category, n_tim_rel, n_tim_dis_gap,
                hidden, layers, kg_lambda):
    n_ent = n_users + n_locs + n_category
    n_rel = (n_tim_rel + n_tim_dis_gap + 1) * 2
    n_wr = (n_tim_rel + n_tim_dis_gap) * 2
    ks = jax.random.split(key, 4 + 4 * layers)
    params = {
        "entities": 0.1 * jax.random.normal(ks[0], (n_ent, hidden), jnp.float32),
        "relations": 0.1 * jax.random.normal(ks[1], (n_rel, hidden), jnp.float32),
        "W_R": 0.1 * jax.random.normal(ks[2], (n_wr, hidden, hidden), jnp.float32),
        "A_in": 0.1 * jax.random.normal(ks[3], (n_ent, n_ent), jnp.float32),
        "kg_lambda": kg_lambda,
        "agg_layers": [],
    }
    for layer_idx in range(layers):
        k1, k2, k3, k4 = ks[4 + 4 * layer_idx: 8 + 4 * layer_idx]
        W1 = 0.1 * jax.random.normal(k1, (hidden, hidden), jnp.float32)  # (out, in)
        b1 = 0.01 * jax.random.normal(k2, (hidden,), jnp.float32)
        W2 = 0.1 * jax.random.normal(k3, (hidden, hidden), jnp.float32)
        b2 = 0.01 * jax.random.normal(k4, (hidden,), jnp.float32)
        params["agg_layers"].append((W1, b1, W2, b2))
    return params


# ----------------------------------------------------------------------------
# Pure-JAX references (for a quick correctness check)
# ----------------------------------------------------------------------------
def _ref_kg_loss(params, h, r, pos_t, neg_t):
    ent, rel, W_R = params["entities"], params["relations"], params["W_R"]
    h_e, r_e = ent[h], rel[r]
    pos_e, neg_e, W_r = ent[pos_t], ent[neg_t], W_R[r]
    rmh = jnp.einsum("bd,bde->be", h_e, W_r)
    rmp = jnp.einsum("bd,bde->be", pos_e, W_r)
    rmn = jnp.einsum("bd,bde->be", neg_e, W_r)
    pos_s = jnp.sum((rmh + r_e - rmp) ** 2, axis=1)
    neg_s = jnp.sum((rmh + r_e - rmn) ** 2, axis=1)
    kg = jnp.mean(-jax.nn.log_sigmoid(neg_s - pos_s))
    l2 = 0.5 * (jnp.mean(jnp.sum(rmh ** 2, 1)) + jnp.mean(jnp.sum(r_e ** 2, 1))
                + jnp.mean(jnp.sum(rmp ** 2, 1)) + jnp.mean(jnp.sum(rmn ** 2, 1)))
    return kg + params["kg_lambda"] * l2


def _ref_cf_embeddings(params):
    ego = params["entities"]
    A = params["A_in"]
    total = ego
    for (W1, b1, W2, b2) in params["agg_layers"]:
        side = A @ ego
        s = jax.nn.leaky_relu((ego + side) @ W1.T + b1, 0.01)
        bi = jax.nn.leaky_relu((ego * side) @ W2.T + b2, 0.01)
        ego = s + bi
        norm = ego / jnp.maximum(
            jnp.sqrt(jnp.sum(ego ** 2, axis=1, keepdims=True)), 1e-12)
        total = total + norm
    return total


# ----------------------------------------------------------------------------
if __name__ == "__main__":
    key = jax.random.PRNGKey(0)
    n_users, n_locs, n_category = 6, 8, 2          # N_ent = 16
    n_tim_rel, n_tim_dis_gap = 3, 4                # N_rel = 16, |W_R| = 14
    hidden = 32
    kg_batch = 8

    pkey, ik = jax.random.split(key)
    params = make_params(pkey, n_users=n_users, n_locs=n_locs,
                         n_category=n_category, n_tim_rel=n_tim_rel,
                         n_tim_dis_gap=n_tim_dis_gap, hidden=hidden,
                         layers=2, kg_lambda=1e-5)

    n_ent = n_users + n_locs + n_category
    n_wr = (n_tim_rel + n_tim_dis_gap) * 2
    k1, k2, k3, k4 = jax.random.split(ik, 4)
    h = jax.random.randint(k1, (kg_batch,), 0, n_ent, dtype=jnp.int32)
    r = jax.random.randint(k2, (kg_batch,), 0, n_wr, dtype=jnp.int32)
    pos_t = jax.random.randint(k3, (kg_batch,), 0, n_ent, dtype=jnp.int32)
    neg_t = jax.random.randint(k4, (kg_batch,), 0, n_ent, dtype=jnp.int32)

    # --- mode 'calc_kg_loss' (gridded Pallas kernel, MXU batched contraction) ---
    loss = ikgn_forward(params, "calc_kg_loss", h, r, pos_t, neg_t)
    loss = jax.block_until_ready(loss)
    loss_ref = jax.block_until_ready(_ref_kg_loss(params, h, r, pos_t, neg_t))
    assert np.allclose(np.asarray(loss), np.asarray(loss_ref),
                       rtol=1e-3, atol=1e-3), \
        f"kg_loss mismatch: {loss} vs {loss_ref}"

    # --- calc_cf_embeddings (tiled Pallas aggregator kernel, used by 'predict') ---
    all_embed = jax.block_until_ready(calc_cf_embeddings(params))
    all_embed_ref = jax.block_until_ready(_ref_cf_embeddings(params))
    assert np.allclose(np.asarray(all_embed), np.asarray(all_embed_ref),
                       rtol=1e-2, atol=1e-2), "cf embedding mismatch"

    print("KERNEL_OK")
</pallas_src>

<mosaic_0001>
module attributes {stable_mosaic.version = 11 : i64} {
  func.func @_kg_loss_kernel(%arg0: i32, %arg1: memref<8x3x32xf32, #tpu.memory_space<vmem>>, %arg2: memref<8x32xf32, #tpu.memory_space<vmem>>, %arg3: memref<8x32x32xf32, #tpu.memory_space<vmem>>, %arg4: memref<1x1xf32, #tpu.memory_space<vmem>>, %arg5: memref<1x1xf32, #tpu.memory_space<vmem>>, %arg6: memref<1x1xf32, #tpu.memory_space<vmem>>) attributes {dimension_semantics = [#tpu.dimension_semantics<arbitrary>], iteration_bounds = array<i64: 1>, scalar_prefetch = 0 : i64, scratch_operands = 2 : i64, tpu.core_type = #tpu.core_type<tc>, window_params = [{transform_indices = @transform_0, window_bounds = array<i64: 8, 3, 32>}, {transform_indices = @transform_1, window_bounds = array<i64: 8, 32>}, {transform_indices = @transform_2, window_bounds = array<i64: 8, 32, 32>}, {pipeline_mode = #tpu.pipeline_mode<synchronous>, transform_indices = @transform_3, window_bounds = array<i64: 1, 1>}]} {
    %c0_i32 = arith.constant 0 : i32
    %0 = arith.cmpi eq, %arg0, %c0_i32 : i32
    %1 = arith.extui %0 : i1 to i32
    %c0_i32_0 = arith.constant 0 : i32
    %2 = arith.cmpi ne, %1, %c0_i32_0 : i32
    scf.if %2 {
      %cst_28 = arith.constant 0.000000e+00 : f32
      %70 = vector.broadcast %cst_28 : f32 to vector<1x1xf32>
      %c0_29 = arith.constant 0 : index
      %c0_30 = arith.constant 0 : index
      %71 = vector.load %arg5[%c0_29, %c0_30] : memref<1x1xf32, #tpu.memory_space<vmem>>, vector<1x1xf32>
      tpu.vector_store %arg5[%c0_29, %c0_30], %70 {strides = array<i32>} : memref<1x1xf32, #tpu.memory_space<vmem>>, vector<1x1xf32>,
      %cst_31 = arith.constant 0.000000e+00 : f32
      %72 = vector.broadcast %cst_31 : f32 to vector<1x1xf32>
      %c0_32 = arith.constant 0 : index
      %c0_33 = arith.constant 0 : index
      %73 = vector.load %arg6[%c0_32, %c0_33] : memref<1x1xf32, #tpu.memory_space<vmem>>, vector<1x1xf32>
      tpu.vector_store %arg6[%c0_32, %c0_33], %72 {strides = array<i32>} : memref<1x1xf32, #tpu.memory_space<vmem>>, vector<1x1xf32>,
    } else {
    }
    %c0 = arith.constant 0 : index
    %c0_1 = arith.constant 0 : index
    %c0_2 = arith.constant 0 : index
    %3 = vector.load %arg1[%c0, %c0_1, %c0_2] : memref<8x3x32xf32, #tpu.memory_space<vmem>>, vector<8x3x32xf32>
    %c0_3 = arith.constant 0 : index
    %c0_4 = arith.constant 0 : index
    %c0_5 = arith.constant 0 : index
    %4 = vector.load %arg3[%c0_3, %c0_4, %c0_5] : memref<8x32x32xf32, #tpu.memory_space<vmem>>, vector<8x32x32xf32>
    %c0_6 = arith.constant 0 : index
    %c0_7 = arith.constant 0 : index
    %5 = vector.load %arg2[%c0_6, %c0_7] : memref<8x32xf32, #tpu.memory_space<vmem>>, vector<8x32xf32>
    "tpu.trace_start"() <{level = 10 : i32, message = "bkd,bde->bke"}> : () -> ()
    %cst = arith.constant dense<0.000000e+00> : vector<8x3x32xf32>
    %6 = tpu.matmul %3, %4, %cst {dimension_numbers = #tpu.dot_dimension_numbers<[2], [1], [1], [2], [0, 0, 0, 1, 1, 2], [0], [0]>} : vector<8x3x32xf32>, vector<8x32x32xf32>, vector<8x3x32xf32> -> vector<8x3x32xf32>
    "tpu.trace_stop"() : () -> ()
    %7 = vector.extract_strided_slice %6 {offsets = [0, 0, 0], sizes = [8, 1, 32], strides = [1, 1, 1]} : vector<8x3x32xf32> to vector<8x1x32xf32>
    %8 = vector.shape_cast %7 : vector<8x1x32xf32> to vector<8x32xf32>
    %9 = vector.extract_strided_slice %6 {offsets = [0, 1, 0], sizes = [8, 1, 32], strides = [1, 1, 1]} : vector<8x3x32xf32> to vector<8x1x32xf32>
    %10 = vector.shape_cast %9 : vector<8x1x32xf32> to vector<8x32xf32>
    %11 = vector.extract_strided_slice %6 {offsets = [0, 2, 0], sizes = [8, 1, 32], strides = [1, 1, 1]} : vector<8x3x32xf32> to vector<8x1x32xf32>
    %12 = vector.shape_cast %11 : vector<8x1x32xf32> to vector<8x32xf32>
    %13 = arith.addf %8, %5 : vector<8x32xf32>
    %14 = arith.subf %13, %10 : vector<8x32xf32>
    %15 = arith.addf %8, %5 : vector<8x32xf32>
    %16 = arith.subf %15, %12 : vector<8x32xf32>
    %17 = arith.mulf %14, %14 : vector<8x32xf32>
    %cst_8 = arith.constant dense<0.000000e+00> : vector<8xf32>
    %18 = vector.multi_reduction <add>, %17, %cst_8 [1] : vector<8x32xf32> to vector<8xf32>
    %19 = vector.shape_cast %18 : vector<8xf32> to vector<8x1xf32>
    %20 = arith.mulf %16, %16 : vector<8x32xf32>
    %cst_9 = arith.constant dense<0.000000e+00> : vector<8xf32>
    %21 = vector.multi_reduction <add>, %20, %cst_9 [1] : vector<8x32xf32> to vector<8xf32>
    %22 = vector.shape_cast %21 : vector<8xf32> to vector<8x1xf32>
    %23 = arith.subf %22, %19 : vector<8x1xf32>
    %cst_10 = arith.constant 0.000000e+00 : f32
    %24 = vector.broadcast %cst_10 : f32 to vector<8x1xf32>
    %25 = arith.subf %24, %23 : vector<8x1xf32>
    %cst_11 = arith.constant 0.000000e+00 : f32
    %26 = vector.broadcast %cst_11 : f32 to vector<8x1xf32>
    %27 = arith.maximumf %25, %26 : vector<8x1xf32>
    %28 = math.absf %23 : vector<8x1xf32>
    %cst_12 = arith.constant 0.000000e+00 : f32
    %29 = vector.broadcast %cst_12 : f32 to vector<8x1xf32>
    %30 = arith.subf %29, %28 : vector<8x1xf32>
    %31 = math.exp %30 : vector<8x1xf32>
    %32 = math.log1p %31 : vector<8x1xf32>
    %33 = arith.addf %27, %32 : vector<8x1xf32>
    %34 = tpu.iota {dimensions = array<i32: 0>} : vector<8x1xi32>
    %c8_i32 = arith.constant 8 : i32
    %35 = arith.muli %arg0, %c8_i32 : i32
    %36 = vector.broadcast %35 : i32 to vector<8x1xi32>
    %37 = arith.addi %34, %36 : vector<8x1xi32>
    %c8_i32_13 = arith.constant 8 : i32
    %38 = vector.broadcast %c8_i32_13 : i32 to vector<8x1xi32>
    %39 = arith.cmpi slt, %37, %38 : vector<8x1xi32>
    %40 = arith.extui %39 : vector<8x1xi1> to vector<8x1xi32>
    %41 = arith.sitofp %40 : vector<8x1xi32> to vector<8x1xf32>
    %c0_14 = arith.constant 0 : index
    %c0_15 = arith.constant 0 : index
    %42 = vector.load %arg5[%c0_14, %c0_15] : memref<1x1xf32, #tpu.memory_space<vmem>>, vector<1x1xf32>
    %43 = arith.mulf %33, %41 : vector<8x1xf32>
    %44 = vector.shape_cast %43 : vector<8x1xf32> to vector<1x8x1xf32>
    %cst_16 = arith.constant dense<0.000000e+00> : vector<1xf32>
    %45 = vector.multi_reduction <add>, %44, %cst_16 [1, 2] : vector<1x8x1xf32> to vector<1xf32>
    %46 = vector.shape_cast %45 : vector<1xf32> to vector<1x1x1xf32>
    %47 = vector.extract %46[0, 0, 0] : f32 from vector<1x1x1xf32>
    %48 = vector.broadcast %47 : f32 to vector<1x1xf32>
    %49 = arith.addf %42, %48 : vector<1x1xf32>
    %c0_17 = arith.constant 0 : index
    %c0_18 = arith.constant 0 : index
    %50 = vector.load %arg5[%c0_17, %c0_18] : memref<1x1xf32, #tpu.memory_space<vmem>>, vector<1x1xf32>
    tpu.vector_store %arg5[%c0_17, %c0_18], %49 {strides = array<i32>} : memref<1x1xf32, #tpu.memory_space<vmem>>, vector<1x1xf32>,
    %c0_19 = arith.constant 0 : index
    %c0_20 = arith.constant 0 : index
    %51 = vector.load %arg6[%c0_19, %c0_20] : memref<1x1xf32, #tpu.memory_space<vmem>>, vector<1x1xf32>
    %52 = arith.mulf %6, %6 : vector<8x3x32xf32>
    %53 = vector.shape_cast %52 : vector<8x3x32xf32> to vector<1x8x3x32xf32>
    %cst_21 = arith.constant dense<0.000000e+00> : vector<1xf32>
    %54 = vector.multi_reduction <add>, %53, %cst_21 [1, 2, 3] : vector<1x8x3x32xf32> to vector<1xf32>
    %55 = vector.shape_cast %54 : vector<1xf32> to vector<1x1x1x1xf32>
    %56 = vector.extract %55[0, 0, 0, 0] : f32 from vector<1x1x1x1xf32>
    %57 = arith.mulf %5, %5 : vector<8x32xf32>
    %58 = vector.shape_cast %57 : vector<8x32xf32> to vector<1x8x32xf32>
    %cst_22 = arith.constant dense<0.000000e+00> : vector<1xf32>
    %59 = vector.multi_reduction <add>, %58, %cst_22 [1, 2] : vector<1x8x32xf32> to vector<1xf32>
    %60 = vector.shape_cast %59 : vector<1xf32> to vector<1x1x1xf32>
    %61 = vector.extract %60[0, 0, 0] : f32 from vector<1x1x1xf32>
    %62 = arith.addf %56, %61 : f32
    %cst_23 = arith.constant 5.000000e-01 : f32
    %63 = arith.mulf %cst_23, %62 : f32
    %64 = vector.broadcast %63 : f32 to vector<1x1xf32>
    %65 = arith.addf %51, %64 : vector<1x1xf32>
    %c0_24 = arith.constant 0 : index
    %c0_25 = arith.constant 0 : index
    %66 = vector.load %arg6[%c0_24, %c0_25] : memref<1x1xf32, #tpu.memory_space<vmem>>, vector<1x1xf32>
    tpu.vector_store %arg6[%c0_24, %c0_25], %65 {strides = array<i32>} : memref<1x1xf32, #tpu.memory_space<vmem>>, vector<1x1xf32>,
    %c0_i32_26 = arith.constant 0 : i32
    %67 = arith.cmpi eq, %arg0, %c0_i32_26 : i32
    %68 = arith.extui %67 : i1 to i32
    %c0_i32_27 = arith.constant 0 : i32
    %69 = arith.cmpi ne, %68, %c0_i32_27 : i32
    scf.if %69 {
      %c0_28 = arith.constant 0 : index
      %c0_29 = arith.constant 0 : index
      %70 = vector.load %arg5[%c0_28, %c0_29] : memref<1x1xf32, #tpu.memory_space<vmem>>, vector<1x1xf32>
      %c0_30 = arith.constant 0 : index
      %c0_31 = arith.constant 0 : index
      %71 = vector.load %arg6[%c0_30, %c0_31] : memref<1x1xf32, #tpu.memory_space<vmem>>, vector<1x1xf32>
      %cst_32 = arith.constant 9.99999974E-6 : f32
      %72 = vector.broadcast %cst_32 : f32 to vector<1x1xf32>
      %73 = arith.mulf %72, %71 : vector<1x1xf32>
      %74 = arith.addf %70, %73 : vector<1x1xf32>
      %cst_33 = arith.constant 1.250000e-01 : f32
      %75 = vector.broadcast %cst_33 : f32 to vector<1x1xf32>
      %76 = arith.mulf %74, %75 : vector<1x1xf32>
      %c0_34 = arith.constant 0 : index
      %c0_35 = arith.constant 0 : index
      %77 = vector.load %arg4[%c0_34, %c0_35] : memref<1x1xf32, #tpu.memory_space<vmem>>, vector<1x1xf32>
      tpu.vector_store %arg4[%c0_34, %c0_35], %76 {strides = array<i32>} : memref<1x1xf32, #tpu.memory_space<vmem>>, vector<1x1xf32>,
    } else {
    }
    return
  }
  func.func @transform_0(%arg0: i32) -> (i32, i32, i32) {
    %c0_i32 = arith.constant 0 : i32
    %c0_i32_0 = arith.constant 0 : i32
    %c0_i32_1 = arith.constant 0 : i32
    return %arg0, %c0_i32, %c0_i32_0 : i32, i32, i32
  }
  func.func @transform_1(%arg0: i32) -> (i32, i32) {
    %c0_i32 = arith.constant 0 : i32
    %c0_i32_0 = arith.constant 0 : i32
    return %arg0, %c0_i32 : i32, i32
  }
  func.func @transform_2(%arg0: i32) -> (i32, i32, i32) {
    %c0_i32 = arith.constant 0 : i32
    %c0_i32_0 = arith.constant 0 : i32
    %c0_i32_1 = arith.constant 0 : i32
    return %arg0, %c0_i32, %c0_i32_0 : i32, i32, i32
  }
  func.func @transform_3(%arg0: i32) -> (i32, i32) {
    %c0_i32 = arith.constant 0 : i32
    %c0_i32_0 = arith.constant 0 : i32
    %c0_i32_1 = arith.constant 0 : i32
    return %c0_i32, %c0_i32_0 : i32, i32
  }
}

</mosaic_0001>

<bundles_post_ra>
// kernel: tpu_custom_call.1
= control target key start
LH: loop header
LB: loop body
LE: loop exit
PB: predicated region body
PF: predicated region fallthrough
CT: control target
= control target key end

     0   :  { %8 = vsyncpa [#allocation5], 0  ;;  %s1338_s0 = inlined_call_operand.vmem [shape: f32[8,3,32], index: 0, kind: input, shape index: {}]   ;;  %s1339_s1 = inlined_call_operand.vmem [shape: f32[8,32], index: 1, kind: input, shape index: {}]   ;;  %s1340_s2 = inlined_call_operand.hbm [shape: f32[8,32,32], index: 2, kind: input, shape index: {}]   ;;  %s1341_s3 = inlined_call_operand.hbm [shape: f32[1,1], index: 3, kind: output, shape index: {}]  }
   0x1   :  { %9 = vsyncpa [#allocation6], 0  ;;  %s1182_s12 = smov [#allocation4]   ;;  %s1134_s16 = scalar_lea.hbm %s1340_s2, 4096 }
   0x2   :  { %s19_s13 = sshll.u32 %s1182_s12, 4  ;;  %p1135_p0 = scmp.ne.s32.totalorder %s1340_s2, %s1134_s16  ;;  %s20_s13 = int_to_ptr.vmem [resolvable:$true] %s19_s13 }
   0x3   :  { %p1138_p1 = scmp.lt.u32.totalorder %s1134_s16, %s1340_s2 }
   0x5   :  { %p1140_p2 = pnand %p1138_p1, %p1135_p0 }
   0x7   :  { %1143 = shalt.err (!%p1140_p2)
}
   0x8   :  { %s1144_s21 = scalar_lea.vmem %s20_s13, 4096  ;;  %p1149_p4 = scmp.lt.s32.totalorder %s20_s13, %s20_s13 }
   0x9   :  { %p1145_p3 = scmp.ne.s32.totalorder %s20_s13, %s1144_s21  ;;  %p1150_p5 = scmp.lt.s32.totalorder %s1144_s21, %s1144_s21 }
   0xb   :  { %p1151_p6 = por %p1150_p5, %p1149_p4 }
   0xd   :  { %p1152_p7 = pnand %p1151_p6, %p1145_p3 }
   0xf   :  { %1155 = shalt.err (!%p1152_p7)
}
  0x10   :  { %s1183_s22 = smov 128   ;;  %s1184_s23 = smov 8  }
  0x11   :  { %25 = dma.hbm_to_vmem [thread:$0]  %s1340_s2, 4096, %s20_s13, [#allocation5], %s1183_s22, %s1183_s22, %s1184_s23  }
  0x12   :  { %1178 = dma.done.wait [#allocation5], 4096  }
  0x13   :  { %1179 = vsyncadd [#allocation5], 4294963200  ;;  %v1185_v0 = vmov 0.0|0.0   ;;  %vm1186_vm0 = vmmov 0   ;;  %v1187_v1 = vmov 0.0   ;;  %v44_v2 = vld [vmem:[#allocation4] sm:$0xff] }
  0x14   :  { %1069 = vmatprep.subr.bf16.mxu0 %v1185_v0  ;;  %1075 = vmatprep.subr.bf16.mxu1 %v1185_v0  ;;  %v45_v3 = vld [vmem:[#allocation4 + $0x8] sm:$0xff]  ;;  %v48_v4 = vld [vmem:[#allocation4 + $0x20] sm:$0xff]  ;;  %v46_v7 = vld [vmem:[#allocation4 + $0x10] sm:$0xff]  ;;  %vm77_vm1 = vcmask 261120   ;;  %vm868_vm2 = vcmask 256000   ;;  %vm759_vm3 = vcmask 1041409  }
  0x15   :  { %989 = vmatprep.mubr.msk.f32.mxu0 %vm1186_vm0, %v1187_v1  ;;  %1000 = vmatprep.mubr.msk.f32.mxu1 %vm1186_vm0, %v1187_v1  ;;  %v1070_v5 = vpack.c.bf16 %v45_v3, %v44_v2  ;;  %v49_v6 = vld [vmem:[#allocation4 + $0x28] sm:$0xff]  ;;  %v47_v8 = vld [vmem:[#allocation4 + $0x18] sm:$0xff]  ;;  %v50_v10 = vld [vmem:[#allocation4 + $0x30] sm:$0xff]  ;;  %vm762_vm4 = vcmask 1042434   ;;  %vm765_vm5 = vcmask 1043459   ;;  %vm768_vm6 = vcmask 1044484  }
  0x16   :  { %v1076_v9 = vpack.c.bf16 %v49_v6, %v48_v4  ;;  %v51_v11 = vld [vmem:[#allocation4 + $0x38] sm:$0xff]  ;;  %v1073_v12 = vpack.c.bf16 %v47_v8, %v46_v7  ;;  %v52_v14 = vld [vmem:[#allocation4 + $0x40] sm:$0xff]  ;;  %v53_v15 = vld [vmem:[#allocation4 + $0x48] sm:$0xff]  ;;  %vm771_vm7 = vcmask 1045509   ;;  %vm774_vm8 = vcmask 1046534   ;;  %s1188_s19 = smov [#allocation7]  }
  0x17   :  { %1071 = vmatpush3.bf16.msra.mxu0 %v1070_v5  ;;  %v1079_v13 = vpack.c.bf16 %v51_v11, %v50_v10  ;;  %v56_v16 = vld [vmem:[#allocation4 + $0x60] sm:$0xff]  ;;  %v57_v17 = vld [vmem:[#allocation4 + $0x68] sm:$0xff]  ;;  %v1082_v19 = vpack.c.bf16 %v53_v15, %v52_v14  ;;  %v54_v22 = vld [vmem:[#allocation4 + $0x50] sm:$0xff]  ;;  %vm777_vm9 = vcmask 1047559   ;;  %vm844_vm11 = vcmask 7168   ;;  %s924_s20 = sshll.u32 %s1188_s19, 4  ;;  %s925_s20 = int_to_ptr.vmem [resolvable:$true] %s924_s20 }
  0x18   :  { %1077 = vmatpush3.bf16.msra.mxu1 %v1076_v9  ;;  %1072 = vmatprep.subr.bf16.mxu0 %v1185_v0  ;;  %v36_v18 = vld [vmem:[%s1338_s0] sm:$0x7]  ;;  %v37_v20 = vld [vmem:[%s1338_s0 + $0x4] sm:$0x7]  ;;  %v1088_v21 = vpack.c.bf16 %v57_v17, %v56_v16  ;;  %v58_v24 = vld [vmem:[#allocation4 + $0x70] sm:$0xff]  ;;  %vm33_vm12 = vcmask 0   ;;  %p1161_p9 = scmp.lt.s32.totalorder %s925_s20, %s925_s20 }
  0x19   :  { %1078 = vmatprep.subr.bf16.mxu1 %v1185_v0  ;;  %v55_v23 = vld [vmem:[#allocation4 + $0x58] sm:$0xff]  ;;  %v60_v28 = vld [vmem:[#allocation4 + $0x80] sm:$0xff]  ;;  %v61_v29 = vld [vmem:[#allocation4 + $0x88] sm:$0xff]  ;;  %34 = vst.msk [vmem:[#allocation2] sm:$0x1] %vm33_vm12, %v1187_v1  ;;  %s1156_s21 = scalar_lea.vmem %s925_s20, 16 }
  0x1a   :  { %v59_v25 = vld [vmem:[#allocation4 + $0x78] sm:$0xff]  ;;  %v1085_v26 = vpack.c.bf16 %v55_v23, %v54_v22  ;;  %v64_v30 = vld [vmem:[#allocation4 + $0xa0] sm:$0xff]  ;;  %v65_v31 = vld [vmem:[#allocation4 + $0xa8] sm:$0xff]  ;;  %v1094_v33 = vpack.c.bf16 %v61_v29, %v60_v28  ;;  %35 = vst.msk [vmem:[#allocation3] sm:$0x1] %vm33_vm12, %v1187_v1  ;;  %p1157_p8 = scmp.ne.s32.totalorder %s925_s20, %s1156_s21  ;;  %s1160_s22 = scalar_lea.vmem %s925_s20, 32 }
  0x1b   :  { %1074 = vmatpush3.bf16.msra.mxu0 %v1073_v12  ;;  %v1091_v27 = vpack.c.bf16 %v59_v25, %v58_v24  ;;  %v38_v32 = vld [vmem:[%s1338_s0 + $0x8] sm:$0x7]  ;;  %v39_v34 = vld [vmem:[%s1338_s0 + $0xc] sm:$0x7]  ;;  %v1100_v35 = vpack.c.bf16 %v65_v31, %v64_v30  ;;  %v62_v36 = vld [vmem:[#allocation4 + $0x90] sm:$0xff]  ;;  %p1162_p10 = scmp.lt.s32.totalorder %s1160_s22, %s1156_s21 }
  0x1c   :  { %1080 = vmatpush3.bf16.msra.mxu1 %v1079_v13  ;;  %1081 = vmatprep.subr.bf16.mxu0 %v1185_v0  ;;  %v63_v37 = vld [vmem:[#allocation4 + $0x98] sm:$0xff]  ;;  %v66_v38 = vld [vmem:[#allocation4 + $0xb0] sm:$0xff]  ;;  %v68_v42 = vld [vmem:[#allocation4 + $0xc0] sm:$0xff] }
  0x1d   :  { %1087 = vmatprep.subr.bf16.mxu1 %v1185_v0  ;;  %v67_v39 = vld [vmem:[#allocation4 + $0xb8] sm:$0xff]  ;;  %v1097_v40 = vpack.c.bf16 %v63_v37, %v62_v36  ;;  %v69_v43 = vld [vmem:[#allocation4 + $0xc8] sm:$0xff]  ;;  %v72_v44 = vld [vmem:[#allocation4 + $0xe0] sm:$0xff]  ;;  %p1163_p11 = por %p1162_p10, %p1161_p9 }
  0x1e   :  { %990 = vmatmul.mubr.msk.f32.vlgmr.msra.gmra.mrb[0].mxu0 %vm77_vm1, %v36_v18  ;;  %v1103_v41 = vpack.c.bf16 %v67_v39, %v66_v38  ;;  %v73_v45 = vld [vmem:[#allocation4 + $0xe8] sm:$0xff]  ;;  %v1106_v47 = vpack.c.bf16 %v69_v43, %v68_v42  ;;  %v41_v48 = vld [vmem:[%s1338_s0 + $0x14] sm:$0x7]  ;;  %v71_v51 = vld [vmem:[#allocation4 + $0xd8] sm:$0xff] }
  0x1f   :  { %1001 = vmatmul.mubr.msk.f32.vlgmr.msra.gmra.mrb[0].mxu1 %vm77_vm1, %v37_v20  ;;  %1083 = vmatpush3.bf16.msra.mxu0 %v1082_v19  ;;  %v40_v46 = vld [vmem:[%s1338_s0 + $0x10] sm:$0x7]  ;;  %v1112_v49 = vpack.c.bf16 %v73_v45, %v72_v44  ;;  %v75_v53 = vld [vmem:[#allocation4 + $0xf8] sm:$0xff]  ;;  %p1164_p12 = pnand %p1163_p11, %p1157_p8 }
  0x20   :  { %1089 = vmatpush3.bf16.msra.mxu1 %v1088_v21  ;;  %1084 = vmatprep.subr.bf16.mxu0 %v1185_v0  ;;  %v70_v50 = vld [vmem:[#allocation4 + $0xd0] sm:$0xff]  ;;  %v43_v57 = vld [vmem:[%s1338_s0 + $0x1c] sm:$0x7]  ;;  %v1288_v58 = vld [vmem:[%s1339_s1] sm:$0xff] }
  0x21   :  { %1090 = vmatprep.subr.bf16.mxu1 %v1185_v0  ;;  %1011 = vmatprep.mubr.msk.f32.mxu0 %vm1186_vm0, %v1187_v1  ;;  %v74_v52 = vld [vmem:[#allocation4 + $0xf0] sm:$0xff]  ;;  %v1109_v54 = vpack.c.bf16 %v71_v51, %v70_v50  ;;  %v663_v59 = vrot.slane %v1288_v58, 1  ;;  %v664_v16 = vrot.slane %v1288_v58, 2  ;;  %v665_v17 = vrot.slane %v1288_v58, 3 }
  0x22   :  { %1022 = vmatprep.mubr.msk.f32.mxu1 %vm1186_vm0, %v1187_v1  ;;  %v1115_v55 = vpack.c.bf16 %v75_v53, %v74_v52  ;;  %v42_v56 = vld [vmem:[%s1338_s0 + $0x18] sm:$0x7] }
  0x23   :  { %1086 = vmatpush3.bf16.msra.mxu0 %v1085_v26 }
  0x24   :  { %1092 = vmatpush3.bf16.msra.mxu1 %v1091_v27  ;;  %1093 = vmatprep.subr.bf16.mxu0 %v1185_v0 }
  0x25   :  { %1099 = vmatprep.subr.bf16.mxu1 %v1185_v0 }
  0x26   :  { %1012 = vmatmul.mubr.msk.f32.vlgmr.msra.gmra.mrb[2].mxu0 %vm77_vm1, %v38_v32 }
  0x27   :  { %1023 = vmatmul.mubr.msk.f32.vlgmr.msra.gmra.mrb[2].mxu1 %vm77_vm1, %v39_v34  ;;  %1095 = vmatpush3.bf16.msra.mxu0 %v1094_v33 }
  0x28   :  { %1101 = vmatpush3.bf16.msra.mxu1 %v1100_v35  ;;  %1096 = vmatprep.subr.bf16.mxu0 %v1185_v0 }
  0x29   :  { %1102 = vmatprep.subr.bf16.mxu1 %v1185_v0  ;;  %1033 = vmatprep.mubr.msk.f32.mxu0 %vm1186_vm0, %v1187_v1 }
  0x2a   :  { %1044 = vmatprep.mubr.msk.f32.mxu1 %vm1186_vm0, %v1187_v1 }
  0x2b   :  { %1098 = vmatpush3.bf16.msra.mxu0 %v1097_v40 }
  0x2c   :  { %1104 = vmatpush3.bf16.msra.mxu1 %v1103_v41  ;;  %1105 = vmatprep.subr.bf16.mxu0 %v1185_v0 }
  0x2d   :  { %1111 = vmatprep.subr.bf16.mxu1 %v1185_v0 }
  0x2e   :  { %1034 = vmatmul.mubr.msk.f32.vlgmr.msra.gmra.mrb[4].mxu0 %vm77_vm1, %v40_v46  ;;  %v666_v46 = vrot.slane %v1288_v58, 4 }
  0x2f   :  { %1045 = vmatmul.mubr.msk.f32.vlgmr.msra.gmra.mrb[4].mxu1 %vm77_vm1, %v41_v48  ;;  %1107 = vmatpush3.bf16.msra.mxu0 %v1106_v47 }
  0x30   :  { %1113 = vmatpush3.bf16.msra.mxu1 %v1112_v49  ;;  %1108 = vmatprep.subr.bf16.mxu0 %v1185_v0  ;;  %v667_v49 = vrot.slane %v1288_v58, 5 }
  0x31   :  { %1114 = vmatprep.subr.bf16.mxu1 %v1185_v0  ;;  %1055 = vmatprep.mubr.msk.f32.mxu0 %vm1186_vm0, %v1187_v1 }
  0x32   :  { %1066 = vmatprep.mubr.msk.f32.mxu1 %vm1186_vm0, %v1187_v1 }
  0x33   :  { %1110 = vmatpush3.bf16.msra.mxu0 %v1109_v54 }
  0x34   :  { %1116 = vmatpush3.bf16.msra.mxu1 %v1115_v55 }
  0x36   :  { %1056 = vmatmul.mubr.msk.f32.vlgmr.msra.gmra.mrb[6].mxu0 %vm77_vm1, %v42_v56  ;;  %v668_v56 = vrot.slane %v1288_v58, 6 }
  0x37   :  { %1067 = vmatmul.mubr.msk.f32.vlgmr.msra.gmra.mrb[6].mxu1 %vm77_vm1, %v43_v57  ;;  %v669_v57 = vrot.slane %v1288_v58, 7 }
  0xf1   :  { %v147_v60 = vpop.f32.mrb[0].mxu0 }
  0xf2   :  { %v678_v61 = vadd.f32 %v147_v60, %v1288_v58  ;;  %v694_v62 = vrot.slane %v147_v60, 1  ;;  %v718_v63 = vrot.slane %v147_v60, 2  ;;  %v860_v0 = vmul.f32 %v147_v60, %v147_v60  ;;  %v220_v2 = vpop.f32.mrb[0].mxu1  ;;  %v991_v3 = vpop.f32.mrb[1].mxu0 }
  0xf3   :  { %v679_v4 = vadd.f32 %v663_v59, %v220_v2  ;;  %v695_v5 = vrot.slane %v220_v2, 1  ;;  %v719_v6 = vrot.slane %v220_v2, 2  ;;  %v861_v7 = vmul.f32 %v220_v2, %v220_v2  ;;  %v1002_v8 = vpop.f32.mrb[1].mxu1 }
  0xf4   :  { %v710_v9 = vsub.f32 %v678_v61, %v694_v62  ;;  %v734_v10 = vsub.f32 %v678_v61, %v718_v63  ;;  %v869_v11 = vsel %vm868_vm2, %v860_v0, 0.0 }
  0xf5   :  { %v711_v12 = vsub.f32 %v679_v4, %v695_v5  ;;  %v735_v13 = vsub.f32 %v679_v4, %v719_v6  ;;  %v870_v14 = vsel %vm868_vm2, %v861_v7, 0.0 }
  0xf6   :  { %v871_v15 = vadd.f32 %v870_v14, %v869_v11  ;;  %v742_v18 = vmul.f32 %v710_v9, %v710_v9  ;;  %v783_v19 = vmul.f32 %v734_v10, %v734_v10 }
  0xf7   :  { %v743_v20 = vmul.f32 %v711_v12, %v711_v12  ;;  %v784_v21 = vmul.f32 %v735_v13, %v735_v13 }
  0xf9   :  { %v758_v22 = vrot.slane %v743_v20, 7  ;;  %v799_v23 = vrot.slane %v784_v21, 7  ;;  %v293_v24 = vpop.f32.mrb[2].mxu0 }
  0xfa   :  { %v680_v25 = vadd.f32 %v664_v16, %v293_v24  ;;  %v696_v26 = vrot.slane %v293_v24, 1  ;;  %v720_v27 = vrot.slane %v293_v24, 2  ;;  %v862_v28 = vmul.f32 %v293_v24, %v293_v24  ;;  %v1013_v29 = vpop.f32.mrb[3].mxu0  ;;  %v366_v30 = vpop.f32.mrb[2].mxu1 }
  0xfb   :  { %v760_v31 = vsel %vm759_vm3, %v758_v22, %v742_v18  ;;  %v800_v32 = vsel %vm759_vm3, %v799_v23, %v783_v19  ;;  %v681_v33 = vadd.f32 %v665_v17, %v366_v30  ;;  %v697_v34 = vrot.slane %v366_v30, 1  ;;  %v1024_v35 = vpop.f32.mrb[3].mxu1 }
  0xfc   :  { %v712_v36 = vsub.f32 %v680_v25, %v696_v26  ;;  %v736_v37 = vsub.f32 %v680_v25, %v720_v27  ;;  %v872_v38 = vsel %vm868_vm2, %v862_v28, 0.0  ;;  %v721_v39 = vrot.slane %v366_v30, 2 }
  0xfd   :  { %v873_v40 = vadd.f32 %v872_v38, %v871_v15  ;;  %v713_v41 = vsub.f32 %v681_v33, %v697_v34  ;;  %v863_v42 = vmul.f32 %v366_v30, %v366_v30 }
  0xfe   :  { %v744_v43 = vmul.f32 %v712_v36, %v712_v36  ;;  %v785_v44 = vmul.f32 %v736_v37, %v736_v37  ;;  %v737_v45 = vsub.f32 %v681_v33, %v721_v39 }
  0xff   :  { %v745_v47 = vmul.f32 %v713_v41, %v713_v41  ;;  %v874_v48 = vsel %vm868_vm2, %v863_v42, 0.0 }
 0x100   :  { %v761_v50 = vrot.slane %v744_v43, 6  ;;  %v786_v51 = vmul.f32 %v737_v45, %v737_v45  ;;  %v875_v52 = vadd.f32 %v874_v48, %v873_v40  ;;  %v801_v53 = vrot.slane %v785_v44, 6 }
 0x101   :  { %v764_v54 = vrot.slane %v745_v47, 5  ;;  %v439_v55 = vpop.f32.mrb[4].mxu0 }
 0x102   :  { %v803_v59 = vrot.slane %v786_v51, 5  ;;  %v682_v60 = vadd.f32 %v666_v46, %v439_v55  ;;  %v698_v61 = vrot.slane %v439_v55, 1  ;;  %v722_v62 = vrot.slane %v439_v55, 2  ;;  %v1035_v63 = vpop.f32.mrb[5].mxu0  ;;  %v512_v0 = vpop.f32.mrb[4].mxu1 }
 0x103   :  { %v864_v2 = vmul.f32 %v439_v55, %v439_v55  ;;  %v683_v3 = vadd.f32 %v667_v49, %v512_v0  ;;  %v699_v4 = vrot.slane %v512_v0, 1  ;;  %v723_v5 = vrot.slane %v512_v0, 2  ;;  %v1046_v6 = vpop.f32.mrb[5].mxu1 }
 0x104   :  { %v714_v7 = vsub.f32 %v682_v60, %v698_v61  ;;  %v738_v8 = vsub.f32 %v682_v60, %v722_v62  ;;  %v865_v9 = vmul.f32 %v512_v0, %v512_v0  ;;  %v763_v10 = vsel %vm762_vm4, %v761_v50, %v760_v31 }
 0x105   :  { %v876_v11 = vsel %vm868_vm2, %v864_v2, 0.0  ;;  %v715_v12 = vsub.f32 %v683_v3, %v699_v4  ;;  %v739_v13 = vsub.f32 %v683_v3, %v723_v5  ;;  %v766_v14 = vsel %vm765_vm5, %v764_v54, %v763_v10 }
 0x106   :  { %v746_v15 = vmul.f32 %v714_v7, %v714_v7  ;;  %v787_v16 = vmul.f32 %v738_v8, %v738_v8  ;;  %v802_v17 = vsel %vm762_vm4, %v801_v53, %v800_v32  ;;  %v877_v18 = vadd.f32 %v876_v11, %v875_v52 }
 0x107   :  { %v747_v19 = vmul.f32 %v715_v12, %v715_v12  ;;  %v788_v20 = vmul.f32 %v739_v13, %v739_v13  ;;  %v804_v21 = vsel %vm765_vm5, %v803_v59, %v802_v17  ;;  %v878_v22 = vsel %vm868_vm2, %v865_v9, 0.0 }
 0x108   :  { %v767_v23 = vrot.slane %v746_v15, 4  ;;  %v805_v24 = vrot.slane %v787_v16, 4  ;;  %v879_v25 = vadd.f32 %v878_v22, %v877_v18  ;;  %v893_v4 = vmul.f32 %v1288_v58, %v1288_v58 }
 0x109   :  { %v770_v26 = vrot.slane %v747_v19, 3  ;;  %v807_v27 = vrot.slane %v788_v20, 3  ;;  %v585_v28 = vpop.f32.mrb[6].mxu0 }
 0x10a   :  { %v684_v29 = vadd.f32 %v668_v56, %v585_v28  ;;  %v700_v30 = vrot.slane %v585_v28, 1  ;;  %v724_v31 = vrot.slane %v585_v28, 2  ;;  %v866_v33 = vmul.f32 %v585_v28, %v585_v28  ;;  %v658_v32 = vpop.f32.mrb[6].mxu1  ;;  %v1057_v34 = vpop.f32.mrb[7].mxu0 }
 0x10b   :  { %v685_v35 = vadd.f32 %v669_v57, %v658_v32  ;;  %v701_v36 = vrot.slane %v658_v32, 1  ;;  %v725_v37 = vrot.slane %v658_v32, 2  ;;  %v1068_v38 = vpop.f32.mrb[7].mxu1  ;;  %v769_v39 = vsel %vm768_vm6, %v767_v23, %v766_v14 }
 0x10c   :  { %v716_v40 = vsub.f32 %v684_v29, %v700_v30  ;;  %v740_v41 = vsub.f32 %v684_v29, %v724_v31  ;;  %v772_v42 = vsel %vm771_vm7, %v770_v26, %v769_v39  ;;  %v806_v43 = vsel %vm768_vm6, %v805_v24, %v804_v21 }
 0x10d   :  { %v717_v44 = vsub.f32 %v685_v35, %v701_v36  ;;  %v741_v45 = vsub.f32 %v685_v35, %v725_v37  ;;  %v808_v46 = vsel %vm771_vm7, %v807_v27, %v806_v43  ;;  %v867_v47 = vmul.f32 %v658_v32, %v658_v32 }
 0x10e   :  { %v789_v48 = vmul.f32 %v740_v41, %v740_v41  ;;  %v748_v49 = vmul.f32 %v716_v40, %v716_v40  ;;  %v880_v50 = vsel %vm868_vm2, %v866_v33, 0.0  ;;  %v894_v5 = vsel %vm77_vm1, %v893_v4, 0.0 }
 0x10f   :  { %v749_v51 = vmul.f32 %v717_v44, %v717_v44  ;;  %v790_v52 = vmul.f32 %v741_v45, %v741_v45  ;;  %v881_v53 = vadd.f32 %v880_v50, %v879_v25  ;;  %v882_v54 = vsel %vm868_vm2, %v867_v47, 0.0  ;;  %v842_v44 = vld [vmem:[#allocation2] sm:$0x1]  ;;  %v859_v47 = vld [vmem:[#allocation3] sm:$0x1] }
 0x110   :  { %v773_v55 = vrot.slane %v748_v49, 2  ;;  %v809_v56 = vrot.slane %v789_v48, 2 }
 0x111   :  { %v776_v57 = vrot.slane %v749_v51, 1  ;;  %v811_v59 = vrot.slane %v790_v52, 1  ;;  %v883_v60 = vadd.f32 %v882_v54, %v881_v53 }
 0x112   :  { %v775_v61 = vsel %vm774_vm8, %v773_v55, %v772_v42  ;;  %v810_v62 = vsel %vm774_vm8, %v809_v56, %v808_v46 }
 0x113   :  { %v778_v63 = vsel %vm777_vm9, %v776_v57, %v775_v61  ;;  %v812_v0 = vsel %vm777_vm9, %v811_v59, %v810_v62 }
 0x114   :  { %v780_v2 = vsel %vm77_vm1, %v778_v63, 0.0  ;;  %v814_v3 = vsel %vm77_vm1, %v812_v0, 0.0 }
 0x115   :  { %781 = vadd.xlane.f32.xlu0 %v780_v2 }
 0x119   :  { %815 = vadd.xlane.f32.xlu0 %v814_v3 }
 0x11d   :  { %895 = vadd.xlane.f32.xlu0 %v894_v5 }
 0x1a2   :  { %v782_v6 = vpop.xlane.xlu0 %781 }
 0x1a6   :  { %v816_v7 = vpop.xlane.xlu0 %815 }
 0x1a7   :  { %v817_v8 = vsub.f32 %v816_v7, %v782_v6 }
 0x1a9   :  { %v820_v9 = vand.u32 2147483647, %v817_v8  ;;  %v818_v16 = vsub.f32 0.0, %v817_v8 }
 0x1aa   :  { %v896_v24 = vpop.xlane.xlu0 %895 }
 0x1ab   :  { %v821_v10 = vsub.f32 0.0, %v820_v9  ;;  %v819_v20 = vmax.f32 %v818_v16, 0.0  ;;  %v897_v25 = vrot.slane %v896_v24, 4 }
 0x1ad   :  { %v822_v11 = vmul.f32 1.442695, %v821_v10  ;;  %v898_v26 = vadd.f32 %v897_v25, %v896_v24 }
 0x1af   :  { %1130 = vpow2.f32 %v822_v11  ;;  %v899_v30 = vrot.slane %v898_v26, 2 }
 0x1b1   :  { %v900_v36 = vadd.f32 %v899_v30, %v898_v26 }
 0x1b3   :  { %v901_v41 = vrot.slane %v900_v36, 1 }
 0x1b5   :  { %v902_v43 = vadd.f32 %v901_v41, %v900_v36 }
 0x1b9   :  { %v1131_v12 = vpop.eup %1130 }
 0x1ba   :  { %v824_v13 = vadd.f32 1.0, %v1131_v12  ;;  %v827_v14 = vmul.f32 -0.5, %v1131_v12  ;;  %v830_v17 = vand.u32 2147483647, %v1131_v12 }
 0x1bc   :  { %1132 = vlog2.f32 %v824_v13  ;;  %v828_v15 = vadd.f32 1.0, %v827_v14  ;;  %vm831_vm10 = vcmp.lt.f32.partialorder %v830_v17, 0.0004427343 }
 0x1be   :  { %v829_v58 = vmul.f32 %v1131_v12, %v828_v15 }
 0x1c6   :  { %v1133_v18 = vpop.eup %1132 }
 0x1c7   :  { %v826_v19 = vmul.f32 0.6931472, %v1133_v18 }
 0x1c9   :  { %v832_v21 = vsel %vm831_vm10, %v829_v58, %v826_v19 }
 0x1ca   :  { %v833_v22 = vadd.f32 %v832_v21, %v819_v20 }
 0x1cc   :  { %v845_v23 = vsel %vm844_vm11, %v833_v22, 0.0 }
 0x1cd   :  { %846 = vadd.xlane.f32.xlu1 %v845_v23 }
 0x1d1   :  { %884 = vadd.xlane.f32.xlu1 %v883_v60 }
 0x25a   :  { %v847_v27 = vpop.xlane.xlu1 %846 }
 0x25b   :  { %v848_v28 = vrot.slane %v847_v27, 4 }
 0x25d   :  { %v849_v29 = vadd.f32 %v848_v28, %v847_v27 }
 0x25e   :  { %v885_v31 = vpop.xlane.xlu1 %884 }
 0x25f   :  { %v850_v33 = vrot.slane %v849_v29, 2  ;;  %v886_v32 = vrot.slane %v885_v31, 4 }
 0x261   :  { %v887_v34 = vadd.f32 %v886_v32, %v885_v31  ;;  %v851_v35 = vadd.f32 %v850_v33, %v849_v29 }
 0x263   :  { %v888_v37 = vrot.slane %v887_v34, 2  ;;  %v852_v38 = vrot.slane %v851_v35, 1 }
 0x265   :  { %v889_v39 = vadd.f32 %v888_v37, %v887_v34  ;;  %v853_v40 = vadd.f32 %v852_v38, %v851_v35 }
 0x267   :  { %1117 = vpush %v853_v40  ;;  %v890_v1 = vrot.slane %v889_v39, 1 }
 0x269   :  { %v891_v42 = vadd.f32 %v890_v1, %v889_v39 }
 0x26b   :  { %1119 = vpush %v891_v42 }
 0x26c   :  { %1121 = vpush %v902_v43 }
 0x298   :  { %s1118_s0 = spop %1117 }
 0x299   :  { %v855_v45 = vstv %s1118_s0 }
 0x29a   :  { %v856_v46 = vadd.f32 %v855_v45, %v842_v44 }
 0x29c   :  { %858 = vst.msk [vmem:[#allocation2] sm:$0x1] %vm33_vm12, %v856_v46  ;;  %s1120_s1 = spop %1119 }
 0x29d   :  { %s1122_s16 = spop %1121 }
 0x29e   :  { %s904_s17 = sadd.f32 %s1122_s16, %s1120_s1 }
 0x2a0   :  { %s905_s18 = smul.f32 0.5, %s904_s17 }
 0x2a2   :  { %v906_v48 = vstv %s905_s18 }
 0x2a3   :  { %v907_v49 = vadd.f32 %v906_v48, %v859_v47  ;;  %v912_v52 = vld [vmem:[#allocation2] sm:$0x1] }
 0x2a5   :  { %908 = vst.msk [vmem:[#allocation3] sm:$0x1] %vm33_vm12, %v907_v49 }
 0x2ac   :  { %v913_v50 = vld [vmem:[#allocation3] sm:$0x1] }
 0x2ad   :  { %v914_v51 = vmul.f32 1e-05, %v913_v50 }
 0x2af   :  { %v915_v53 = vadd.f32 %v914_v51, %v912_v52 }
 0x2b1   :  { %v916_v54 = vmul.f32 0.125, %v915_v53 }
 0x2b3   :  { %917 = vst.msk [vmem:[#allocation7] sm:$0x1] %vm33_vm12, %v916_v54 }
 0x2b4   :  { %1167 = shalt.err (!%p1164_p12)
}
 0x2b5   :  { %s1168_s25 = scalar_lea.hbm %s1341_s3, 16 }
 0x2b6   :  { %p1169_p13 = scmp.ne.s32.totalorder %s1341_s3, %s1168_s25  ;;  %p1172_p0 = scmp.lt.u32.totalorder %s1168_s25, %s1341_s3 }
 0x2b8   :  { %p1174_p1 = pnand %p1172_p0, %p1169_p13 }
 0x2ba   :  { %1177 = shalt.err (!%p1174_p1)
}
 0x2bb   :  { %927 = dma.vmem_to_hbm [thread:$0]  %s925_s20, 16, %s1341_s3, [#allocation6]  }
 0x2bc   :  { %1180 = dma.done.wait [#allocation6], 16  }
 0x2bd   :  { %1181 = vsyncadd [#allocation6], 4294967280 }
 0x2be   :  { %931 = vsyncpa [#allocation5], 1 }
 0x2bf   :  { %932 = vsyncpa [#allocation6], 1 }

</bundles_post_ra>
